<compile_context>
chip_gen: v6e
topology: v6e:2x2x1
jax: 0.10.0
libtpu: 0.0.40
codegen_flags: <defaults>
</compile_context>

<pallas_src>
import functools

import jax
import jax.numpy as jnp
from jax import lax
from jax.experimental import pallas as pl
from jax.experimental.pallas import tpu as pltpu

_LANE = 128
_SUBLANE = 8


def head_kernel(x_ref, w_ref, b_ref, o_ref):
    # In-register cast (VPU, hidden under the matmul) so the wrapper never
    # does a separate HBM cast pass over x.
    x = x_ref[...].astype(w_ref.dtype)
    # (TB, E) @ (E, C_pad) — weight already pre-transposed at prep time, so no
    # per-tile XLU transpose; f32 accumulation on the MXU.
    logits = lax.dot_general(
        x, w_ref[...],
        dimension_numbers=(((1,), (0,)), ((), ())),
        preferred_element_type=jnp.float32,
    )
    logits = logits + b_ref[...]          # bias broadcast over batch rows
    # Softmax over classes (== PyTorch Softmax(dim=1) for 2-D input).
    # Padded classes carry bias = -inf -> exp() == 0, never contribute.
    m = jnp.max(logits, axis=-1, keepdims=True)
    e = jnp.exp(logits - m)
    s = jnp.sum(e, axis=-1, keepdims=True)
    # Exact reciprocal: only TB of them per tile, so the approx-EUP saving is
    # negligible and exact keeps rows summing to 1.
    o_ref[...] = (e * pl.reciprocal(s)).astype(o_ref.dtype)


def _round_up(n, m):
    return ((n + m - 1) // m) * m


def _cdiv(a, b):
    return (a + b - 1) // b


def prepare_head_params(weight, bias, compute_dtype=jnp.float32,
                        class_pad_to=_LANE):
    """One-time (static-parameter) prep.

    weight: (C, E) as in nn.Linear; bias: (C,).
    Returns (w_pad, b_pad) with shapes (E, C_pad) and (1, C_pad):
      * weight is transposed ONCE so the kernel's MXU contraction is a plain
        (TB, E) @ (E, C_pad) with no per-tile relayout,
      * the class dim is padded to `class_pad_to` lanes (128 default; 256 is a
        slightly better fit for the 256x256 MXU on v6e/v7x when C is large),
        padded weight columns = 0 and padded bias entries = -inf so the softmax
        over the real classes is numerically unchanged.
    compute_dtype=jnp.bfloat16 halves HBM traffic / VMEM on ALL generations
    (v5e's bf16 restrictions are VPU/EUP-side; the MXU takes bf16 natively and
    all softmax math in the kernel stays f32).
    """
    C, E = weight.shape
    C_pad = _round_up(C, class_pad_to)
    w_pad = jnp.zeros((E, C_pad), dtype=compute_dtype).at[:, :C].set(
        weight.astype(compute_dtype).T)
    b_pad = jnp.full((1, C_pad), -jnp.inf, dtype=jnp.float32).at[0, :C].set(
        bias.astype(jnp.float32))
    return w_pad, b_pad


def _vmem_capacity_bytes():
    """Generation-aware VMEM capacity (128 MiB on v5e/v6e, 64 MiB on v7x)."""
    try:
        return int(pltpu.get_tpu_info().vmem_capacity_bytes)
    except Exception:
        return 64 * 1024 * 1024   # conservative fallback (v7x-sized)


def _pick_batch_tile(B, E, C_pad, x_itemsize, w_itemsize, out_itemsize,
                     vmem_budget_bytes):
    """Pick the batch tile TB.

    Rules (from review):
      * count the index-map-constant weight/bias at 2x (Pallas double-buffers
        every input),
      * keep at least 2 balanced batch tiles when B permits so both v7x
        TensorCores get work under dimension_semantics=("parallel",),
      * floor TB at 128 (MXU fill / per-step overhead) when B allows; if the
        budget would force TB below that, class/K tiling is the right fix —
        not a tiny batch tile.
    """
    B_pad = _round_up(B, _SUBLANE)
    resident = 2 * (C_pad * E * w_itemsize + C_pad * 4)   # weight + bias, 2x

    tb_cap = 512
    if B_pad >= 2 * _LANE:
        # Ensure >= 2 balanced tiles (each still >= 128 rows).
        tb_cap = min(tb_cap, _round_up(_cdiv(B_pad, 2), _SUBLANE))
    tb = min(tb_cap, B_pad)
    tb = _round_up(tb, _SUBLANE)

    while tb > _SUBLANE:
        per_step = 2 * tb * E * x_itemsize + 2 * tb * C_pad * out_itemsize
        if resident + per_step <= vmem_budget_bytes:
            break
        tb = _round_up(tb // 2, _SUBLANE)

    # Floor: never drop below an MXU-height batch tile when B allows.
    # TODO(synk): if C_pad*E ever gets large enough that this floor + the 2x
    # resident weight overflow v7x's 64 MiB VMEM, add a class-tile grid axis
    # with an online softmax (running max/sum in VMEM scratch) instead of
    # shrinking TB further.
    tb = max(tb, min(_LANE, B_pad))
    return min(tb, B_pad)


@functools.partial(jax.jit,
                   static_argnames=("class_num", "out_dtype", "slice_output"))
def head_forward(x, w_pad, b_pad, *, class_num, out_dtype=jnp.float32,
                 slice_output=True):
    """x: (B, E); w_pad: (E, C_pad); b_pad: (1, C_pad).

    Returns (B, class_num) if slice_output else the padded (B, C_pad) array
    (padded columns are exactly 0).  Pass slice_output=False when a downstream
    consumer can take the padded array — the slice is an extra full output
    pass on a memory-bound op.  out_dtype=bf16 halves output HBM bytes and the
    per-step output double-buffer (accumulation/softmax stay f32 in-kernel).
    """
    B, E = x.shape
    C_pad = w_pad.shape[1]
    out_itemsize = jnp.dtype(out_dtype).itemsize

    cap = _vmem_capacity_bytes()
    vmem_budget = int(cap * 3 // 4)       # ~96 MiB on v5e/v6e, ~48 MiB on v7x

    tb = _pick_batch_tile(B, E, C_pad, x.dtype.itemsize, w_pad.dtype.itemsize,
                          out_itemsize, vmem_budget)
    grid = (_cdiv(B, tb),)

    resident = 2 * (C_pad * E * w_pad.dtype.itemsize + C_pad * 4)
    per_step = 2 * tb * E * x.dtype.itemsize + 2 * tb * C_pad * out_itemsize
    vmem_limit = int(min(max((resident + per_step) * 5 // 4,
                             32 * 1024 * 1024),
                         vmem_budget))

    out_pad = pl.pallas_call(
        head_kernel,
        out_shape=jax.ShapeDtypeStruct((B, C_pad), out_dtype),
        grid_spec=pltpu.PrefetchScalarGridSpec(
            num_scalar_prefetch=0,
            grid=grid,
            in_specs=[
                pl.BlockSpec((tb, E), lambda i: (i, 0)),      # batch-tiled x
                pl.BlockSpec((E, C_pad), lambda i: (0, 0)),   # resident weight
                pl.BlockSpec((1, C_pad), lambda i: (0, 0)),   # resident bias
            ],
            out_specs=pl.BlockSpec((tb, C_pad), lambda i: (i, 0)),
        ),
        compiler_params=pltpu.CompilerParams(
            dimension_semantics=("parallel",),   # megacore-shardable on v7x
            vmem_limit_bytes=vmem_limit,
        ),
    )(x, w_pad, b_pad)

    if slice_output:
        return out_pad[:, :class_num]
    return out_pad


if __name__ == "__main__":
    # Small shapes consistent with Head(embed_dim, class_num)
    B, embed_dim, class_num = 8, 32, 16

    key = jax.random.PRNGKey(0)
    kx, kw, kb = jax.random.split(key, 3)

    x = jax.random.normal(kx, (B, embed_dim), dtype=jnp.float32)
    # Deterministic parameter init (mimics nn.Linear uniform(-1/sqrt(E), 1/sqrt(E)))
    bound = 1.0 / (embed_dim ** 0.5)
    weight = jax.random.uniform(kw, (class_num, embed_dim),
                                minval=-bound, maxval=bound, dtype=jnp.float32)
    bias = jax.random.uniform(kb, (class_num,),
                              minval=-bound, maxval=bound, dtype=jnp.float32)

    # Static-parameter prep (done once).  compute_dtype=jnp.bfloat16 is the
    # recommended production knob on every TPU generation; keep f32 here so
    # the correctness check below is tight.
    w_pad, b_pad = prepare_head_params(weight, bias, compute_dtype=jnp.float32)

    out = head_forward(x, w_pad, b_pad, class_num=class_num)
    out = jax.block_until_ready(out)

    # Reference check in plain JAX
    ref = jax.nn.softmax(x @ weight.T + bias, axis=1)
    assert out.shape == (B, class_num)
    assert jnp.allclose(out, ref, atol=1e-4, rtol=1e-4)
    assert jnp.allclose(jnp.sum(out, axis=1), 1.0, atol=1e-4)

    print("KERNEL_OK")
</pallas_src>

<mosaic_0001>
module attributes {stable_mosaic.version = 11 : i64} {
  func.func @head_kernel(%arg0: i32, %arg1: memref<8x32xf32, #tpu.memory_space<vmem>>, %arg2: memref<32x128xf32, #tpu.memory_space<vmem>>, %arg3: memref<1x128xf32, #tpu.memory_space<vmem>>, %arg4: memref<8x128xf32, #tpu.memory_space<vmem>>) attributes {dimension_semantics = [#tpu.dimension_semantics<parallel>], iteration_bounds = array<i64: 1>, scalar_prefetch = 0 : i64, scratch_operands = 0 : i64, tpu.core_type = #tpu.core_type<tc>, window_params = [{transform_indices = @transform_0, window_bounds = array<i64: 8, 32>}, {pipeline_mode = #tpu.pipeline_mode<synchronous>, transform_indices = @transform_1, window_bounds = array<i64: 32, 128>}, {pipeline_mode = #tpu.pipeline_mode<synchronous>, transform_indices = @transform_2, window_bounds = array<i64: 1, 128>}, {transform_indices = @transform_3, window_bounds = array<i64: 8, 128>}]} {
    %c0 = arith.constant 0 : index
    %c0_0 = arith.constant 0 : index
    %0 = vector.load %arg1[%c0, %c0_0] : memref<8x32xf32, #tpu.memory_space<vmem>>, vector<8x32xf32>
    %c0_1 = arith.constant 0 : index
    %c0_2 = arith.constant 0 : index
    %1 = vector.load %arg2[%c0_1, %c0_2] : memref<32x128xf32, #tpu.memory_space<vmem>>, vector<32x128xf32>
    %cst = arith.constant dense<0.000000e+00> : vector<8x128xf32>
    %2 = tpu.matmul %0, %1, %cst {dimension_numbers = #tpu.dot_dimension_numbers<[1], [0], [0], [1], [0, 0, 1, 1], [], []>} : vector<8x32xf32>, vector<32x128xf32>, vector<8x128xf32> -> vector<8x128xf32>
    %c0_3 = arith.constant 0 : index
    %c0_4 = arith.constant 0 : index
    %3 = vector.load %arg3[%c0_3, %c0_4] : memref<1x128xf32, #tpu.memory_space<vmem>>, vector<1x128xf32>
    %4 = vector.broadcast %3 : vector<1x128xf32> to vector<8x128xf32>
    %5 = arith.addf %2, %4 : vector<8x128xf32>
    %cst_5 = arith.constant dense<0xFF800000> : vector<8xf32>
    %6 = vector.multi_reduction <maximumf>, %5, %cst_5 [1] : vector<8x128xf32> to vector<8xf32>
    %7 = vector.shape_cast %6 : vector<8xf32> to vector<8x1xf32>
    %8 = vector.broadcast %7 : vector<8x1xf32> to vector<8x128xf32>
    %9 = arith.subf %5, %8 : vector<8x128xf32>
    %10 = math.exp %9 : vector<8x128xf32>
    %cst_6 = arith.constant dense<0.000000e+00> : vector<8xf32>
    %11 = vector.multi_reduction <add>, %10, %cst_6 [1] : vector<8x128xf32> to vector<8xf32>
    %12 = vector.shape_cast %11 : vector<8xf32> to vector<8x1xf32>
    %13 = tpu.reciprocal %12 : vector<8x1xf32> -> vector<8x1xf32>
    %14 = vector.broadcast %13 : vector<8x1xf32> to vector<8x128xf32>
    %15 = arith.mulf %10, %14 : vector<8x128xf32>
    %c0_7 = arith.constant 0 : index
    %c0_8 = arith.constant 0 : index
    %16 = vector.load %arg4[%c0_7, %c0_8] : memref<8x128xf32, #tpu.memory_space<vmem>>, vector<8x128xf32>
    tpu.vector_store %arg4[%c0_7, %c0_8], %15 {strides = array<i32>} : memref<8x128xf32, #tpu.memory_space<vmem>>, vector<8x128xf32>,
    return
  }
  func.func @transform_0(%arg0: i32) -> (i32, i32) {
    %c0_i32 = arith.constant 0 : i32
    %c0_i32_0 = arith.constant 0 : i32
    return %arg0, %c0_i32 : i32, i32
  }
  func.func @transform_1(%arg0: i32) -> (i32, i32) {
    %c0_i32 = arith.constant 0 : i32
    %c0_i32_0 = arith.constant 0 : i32
    %c0_i32_1 = arith.constant 0 : i32
    return %c0_i32, %c0_i32_0 : i32, i32
  }
  func.func @transform_2(%arg0: i32) -> (i32, i32) {
    %c0_i32 = arith.constant 0 : i32
    %c0_i32_0 = arith.constant 0 : i32
    %c0_i32_1 = arith.constant 0 : i32
    return %c0_i32, %c0_i32_0 : i32, i32
  }
  func.func @transform_3(%arg0: i32) -> (i32, i32) {
    %c0_i32 = arith.constant 0 : i32
    %c0_i32_0 = arith.constant 0 : i32
    return %arg0, %c0_i32 : i32, i32
  }
}

</mosaic_0001>

<bundles_post_ra>
// kernel: head_forward.1
= control target key start
LH: loop header
LB: loop body
LE: loop exit
PB: predicated region body
PF: predicated region fallthrough
CT: control target
= control target key end

     0   :  { %8 = vsyncpa [#allocation3], 0  ;;  %s287_s0 = inlined_call_operand.hbm [shape: f32[8,32], index: 0, kind: input, shape index: {}]   ;;  %s288_s1 = inlined_call_operand.hbm [shape: f32[32,128], index: 1, kind: input, shape index: {}]   ;;  %s289_s2 = inlined_call_operand.vmem [shape: f32[1,128], index: 2, kind: input, shape index: {}]   ;;  %s290_s3 = inlined_call_operand.hbm [shape: f32[8,128], index: 3, kind: output, shape index: {}]  }
   0x1   :  { %9 = vsyncpa [#allocation6], 0 }
   0x2   :  { %10 = vsyncpa [#allocation4], 0  ;;  %s248_s12 = smov [#allocation2]   ;;  %s249_s14 = smov [#allocation5]  }
   0x3   :  { %s17_s13 = sshll.u32 %s248_s12, 4  ;;  %s26_s15 = sshll.u32 %s249_s14, 4  ;;  %s18_s13 = int_to_ptr.vmem [resolvable:$true] %s17_s13  ;;  %s27_s15 = int_to_ptr.vmem [resolvable:$true] %s26_s15 }
   0x4   :  { %s190_s16 = scalar_lea.vmem %s18_s13, 128  ;;  %p195_p1 = scmp.lt.s32.totalorder %s18_s13, %s18_s13 }
   0x5   :  { %p191_p0 = scmp.ne.s32.totalorder %s18_s13, %s190_s16  ;;  %p196_p2 = scmp.lt.s32.totalorder %s190_s16, %s190_s16 }
   0x7   :  { %p197_p3 = por %p196_p2, %p195_p1 }
   0x9   :  { %p198_p4 = pnand %p197_p3, %p191_p0 }
   0xb   :  { %201 = shalt.err (!%p198_p4)
}
   0xc   :  { %20 = dma.hbm_to_vmem [thread:$0]  %s287_s0, 128, %s18_s13, [#allocation3]  }
   0xd   :  { %s210_s19 = scalar_lea.vmem %s27_s15, 512  ;;  %p215_p6 = scmp.lt.s32.totalorder %s27_s15, %s27_s15 }
   0xe   :  { %p211_p5 = scmp.ne.s32.totalorder %s27_s15, %s210_s19  ;;  %p216_p7 = scmp.lt.s32.totalorder %s210_s19, %s210_s19 }
  0x10   :  { %p217_p8 = por %p216_p7, %p215_p6 }
  0x12   :  { %p218_p9 = pnand %p217_p8, %p211_p5 }
  0x14   :  { %221 = shalt.err (!%p218_p9)
}
  0x15   :  { %s250_s20 = smov 128   ;;  %s251_s21 = smov 8  }
  0x16   :  { %32 = dma.hbm_to_vmem [thread:$0]  %s288_s1, 512, %s27_s15, [#allocation6], %s250_s20, %s250_s20, %s251_s21  }
  0x17   :  { %242 = dma.done.wait [#allocation3], 128  }
  0x18   :  { %243 = vsyncadd [#allocation3], 4294967168 }
  0x19   :  { %244 = dma.done.wait [#allocation6], 512  }
  0x1a   :  { %245 = vsyncadd [#allocation6], 4294966784  ;;  %v252_v0 = vmov 0.0   ;;  %vm253_vm0 = vmmov 0   ;;  %v45_v1 = vld [vmem:[#allocation5 + $0x18] sm:$0xff]  ;;  %v44_v2 = vld [vmem:[#allocation5 + $0x10] sm:$0xff] }
  0x1b   :  { %160 = vmatprep.subr.mxu0 %v252_v0  ;;  %168 = vmatprep.mubr.msk.f32.mxu0 %vm253_vm0, %v252_v0  ;;  %v43_v3 = vld [vmem:[#allocation5 + $0x8] sm:$0xff]  ;;  %v42_v4 = vld [vmem:[#allocation5] sm:$0xff]  ;;  %v41_v5 = vld [vmem:[#allocation2] sm:$0xff]  ;;  %vm53_vm1 = vcmask 261120   ;;  %s254_s24 = smov [#allocation7]  }
  0x1c   :  { %161 = vmatpush3.msra.mxu0 %v45_v1  ;;  %v153_v6 = vld [vmem:[%s289_s2] ss:$0 sm:$0xff]  ;;  %s143_s25 = sshll.u32 %s254_s24, 4  ;;  %s144_s25 = int_to_ptr.vmem [resolvable:$true] %s143_s25 }
  0x1d   :  { %162 = vmatprep.subr.mxu0 %v252_v0  ;;  %s222_s26 = scalar_lea.vmem %s144_s25, 128  ;;  %p227_p11 = scmp.lt.s32.totalorder %s144_s25, %s144_s25 }
  0x1e   :  { %163 = vmatpush3.msra.mxu0 %v44_v2  ;;  %p223_p10 = scmp.ne.s32.totalorder %s144_s25, %s222_s26  ;;  %p228_p12 = scmp.lt.s32.totalorder %s222_s26, %s222_s26 }
  0x1f   :  { %164 = vmatprep.subr.mxu0 %v252_v0 }
  0x20   :  { %165 = vmatpush3.msra.mxu0 %v43_v3  ;;  %p229_p13 = por %p228_p12, %p227_p11 }
  0x21   :  { %166 = vmatprep.subr.mxu0 %v252_v0 }
  0x22   :  { %167 = vmatpush3.msra.mxu0 %v42_v4  ;;  %p230_p0 = pnand %p229_p13, %p223_p10 }
  0x23   :  { %169 = vmatmul.mubr.msk.f32.vlgmr.msra.gmra.mxu0 %vm53_vm1, %v41_v5 }
  0xe3   :  { %v123_v7 = vpop.f32.mrf.mxu0 }
  0xe4   :  { %v124_v8 = vadd.f32 %v153_v6, %v123_v7 }
  0xe5   :  { %v170_v9 = vpop.f32.mrf.mxu0 }
  0xe6   :  { %127 = vmax.xlane.f32.xlu0 %v124_v8 }
 0x16f   :  { %v128_v10 = vpop.xlane.xlu0 %127 }
 0x170   :  { %v129_v11 = vsub.f32 %v124_v8, %v128_v10 }
 0x172   :  { %v130_v12 = vmul.f32 1.442695, %v129_v11 }
 0x174   :  { %178 = vpow2.f32 %v130_v12 }
 0x181   :  { %v179_v13 = vpop.eup %178 }
 0x182   :  { %132 = vadd.xlane.f32.xlu0 %v179_v13 }
 0x20b   :  { %v133_v14 = vpop.xlane.xlu0 %132 }
 0x20c   :  { %180 = vrcp.f32 %v133_v14 }
 0x219   :  { %v181_v15 = vpop.eup %180 }
 0x21a   :  { %v135_v16 = vmul.f32 %v181_v15, %v179_v13 }
 0x21c   :  { %136 = vst [vmem:[#allocation7] sm:$0xff] %v135_v16 }
 0x21d   :  { %233 = shalt.err (!%p230_p0)
}
 0x21e   :  { %146 = dma.vmem_to_hbm [thread:$0]  %s144_s25, 128, %s290_s3, [#allocation4]  }
 0x21f   :  { %246 = dma.done.wait [#allocation4], 128  }
 0x220   :  { %247 = vsyncadd [#allocation4], 4294967168 }
 0x221   :  { %150 = vsyncpa [#allocation3], 1 }
 0x222   :  { %151 = vsyncpa [#allocation6], 1 }
 0x223   :  { %152 = vsyncpa [#allocation4], 1 }

</bundles_post_ra>
